<compile_context>
chip_gen: v7x
topology: tpu7x:2x2x1
jax: 0.10.0
libtpu: 0.0.40
codegen_flags: <defaults>
</compile_context>

<pallas_src>
import functools
import math

import jax
import jax.numpy as jnp
from jax.experimental import pallas as pl
from jax.experimental.pallas import tpu as pltpu

_LOG2 = math.log(2.0)
_LOG_2PI = math.log(2.0 * math.pi)


def _stable_softplus(z):
    # softplus(z) = max(z, 0) + log1p(exp(-|z|))   (numerically stable)
    return jnp.maximum(z, 0.0) + jnp.log1p(jnp.exp(-jnp.abs(z)))


def _mlp_and_heads(x_ref, w1_ref, b1_ref, w2_ref, b2_ref, wh_ref, bh_ref,
                   out_features):
    """Shared trunk: fc1+ReLU, fc2+ReLU, fused (mu||log_sigma) head."""
    # bf16 MXU inputs, f32 accumulation; bias adds and everything after in f32.
    h1 = jnp.dot(x_ref[...].astype(jnp.bfloat16), w1_ref[...],
                 preferred_element_type=jnp.float32) + b1_ref[...]
    h1 = jnp.maximum(h1, 0.0)
    h2 = jnp.dot(h1.astype(jnp.bfloat16), w2_ref[...],
                 preferred_element_type=jnp.float32) + b2_ref[...]
    h2 = jnp.maximum(h2, 0.0)
    head = jnp.dot(h2.astype(jnp.bfloat16), wh_ref[...],
                   preferred_element_type=jnp.float32) + bh_ref[...]
    mu = head[:, :out_features]
    log_sigma = head[:, out_features:]
    return mu, log_sigma


def pi_net_kernel(x_ref, w1_ref, b1_ref, w2_ref, b2_ref, wh_ref, bh_ref,
                  eps_ref, act_ref, logp_ref, *, act_high, out_features):
    """Stochastic path: action = tanh-squash of rsample, plus log_prob."""
    mu, log_sigma = _mlp_and_heads(x_ref, w1_ref, b1_ref, w2_ref, b2_ref,
                                   wh_ref, bh_ref, out_features)
    eps = eps_ref[...]
    # rsample: a = mu + exp(0.5 * log_sigma) * eps
    a = mu + jnp.exp(0.5 * log_sigma) * eps

    # log_prob = -0.5*(sum(eps^2) + sum(log_sigma) + d*log(2*pi))
    #            - sum(2*(log2 - a - softplus(-2a)))
    # fused into a single per-element expression and ONE cross-lane reduction.
    per_elem = (0.5 * (eps * eps + log_sigma)
                + 2.0 * (_LOG2 - a - _stable_softplus(-2.0 * a)))
    logp_ref[...] = -(jnp.sum(per_elem, axis=-1, keepdims=True)
                      + 0.5 * out_features * _LOG_2PI)

    act_ref[...] = act_high * jnp.tanh(a)


def pi_net_kernel_det(x_ref, w1_ref, b1_ref, w2_ref, b2_ref, wh_ref, bh_ref,
                      act_ref, logp_ref, *, act_high, out_features):
    """Deterministic path: action = mu (no eps DMA, no rsample/std)."""
    mu, log_sigma = _mlp_and_heads(x_ref, w1_ref, b1_ref, w2_ref, b2_ref,
                                   wh_ref, bh_ref, out_features)
    a = mu
    # Mahalanobis term is exactly 0 when action == mu.
    per_elem = (0.5 * log_sigma
                + 2.0 * (_LOG2 - a - _stable_softplus(-2.0 * a)))
    logp_ref[...] = -(jnp.sum(per_elem, axis=-1, keepdims=True)
                      + 0.5 * out_features * _LOG_2PI)
    act_ref[...] = act_high * jnp.tanh(a)


def prepare_params(params):
    """Fuse head weights and cast matmul weights to bf16 (done once)."""
    wh = jnp.concatenate([params["wmu"], params["wls"]], axis=1)
    bh = jnp.concatenate([params["bmu"], params["bls"]], axis=1)
    return dict(
        w1=params["w1"].astype(jnp.bfloat16), b1=params["b1"].astype(jnp.float32),
        w2=params["w2"].astype(jnp.bfloat16), b2=params["b2"].astype(jnp.float32),
        wh=wh.astype(jnp.bfloat16), bh=bh.astype(jnp.float32),
    )


def pi_net_forward(x, kparams, act_high, eps=None, deterministic=False):
    """x: (B, in_features) f32. kparams: output of prepare_params.
    eps: (B, out_features) standard-normal noise (stochastic path only).
    Returns (action (B, out), log_prob (B,))."""
    B, in_features = x.shape
    layer_size = kparams["w1"].shape[1]
    out2 = kparams["wh"].shape[1]
    out_features = out2 // 2

    # Batch tiling: TB is a multiple of 8; large batches get double-buffered
    # pipelining and (on multi-TC chips) megacore sharding of the batch axis.
    TB = 256 if B >= 256 else max(8, -(-B // 8) * 8)
    Bp = -(-B // TB) * TB
    if Bp != B:
        x = jnp.pad(x, ((0, Bp - B), (0, 0)))
        if eps is not None:
            eps = jnp.pad(eps, ((0, Bp - B), (0, 0)))
    grid = (Bp // TB,)

    batch_spec = lambda n: pl.BlockSpec((TB, n), lambda i: (i, 0))
    resident = lambda shape: pl.BlockSpec(shape, lambda i: (0, 0))  # VMEM-resident weights

    weight_specs = [
        resident((in_features, layer_size)), resident((1, layer_size)),
        resident((layer_size, layer_size)), resident((1, layer_size)),
        resident((layer_size, out2)), resident((1, out2)),
    ]
    out_shapes = (
        jax.ShapeDtypeStruct((Bp, out_features), jnp.float32),
        jax.ShapeDtypeStruct((Bp, 1), jnp.float32),
    )
    # TODO(synk): for very large batch-tiled runs, pack action+logp into one
    # lane-dense (TB, 128) output slab to avoid masked partial stores.
    out_specs = (batch_spec(out_features), batch_spec(1))
    compiler_params = pltpu.CompilerParams(dimension_semantics=("parallel",))

    if deterministic:
        kernel = functools.partial(pi_net_kernel_det, act_high=float(act_high),
                                   out_features=out_features)
        action, logp = pl.pallas_call(
            kernel,
            out_shape=out_shapes,
            grid=grid,
            in_specs=[batch_spec(in_features)] + weight_specs,
            out_specs=out_specs,
            compiler_params=compiler_params,
        )(x, kparams["w1"], kparams["b1"], kparams["w2"], kparams["b2"],
          kparams["wh"], kparams["bh"])
    else:
        assert eps is not None, "stochastic path needs eps"
        kernel = functools.partial(pi_net_kernel, act_high=float(act_high),
                                   out_features=out_features)
        action, logp = pl.pallas_call(
            kernel,
            out_shape=out_shapes,
            grid=grid,
            in_specs=[batch_spec(in_features)] + weight_specs
                     + [batch_spec(out_features)],
            out_specs=out_specs,
            compiler_params=compiler_params,
        )(x, kparams["w1"], kparams["b1"], kparams["w2"], kparams["b2"],
          kparams["wh"], kparams["bh"], eps)

    return action[:B], logp[:B, 0]


def init_params(key, in_features, layer_size, out_features):
    """Deterministic init mimicking nn.Linear (uniform +/- 1/sqrt(fan_in)).
    Weights stored pre-transposed as (in, out) in f32."""
    ks = jax.random.split(key, 8)

    def linear(kw, kb, fan_in, fan_out):
        bound = 1.0 / math.sqrt(fan_in)
        w = jax.random.uniform(kw, (fan_in, fan_out), jnp.float32, -bound, bound)
        b = jax.random.uniform(kb, (1, fan_out), jnp.float32, -bound, bound)
        return w, b

    w1, b1 = linear(ks[0], ks[1], in_features, layer_size)
    w2, b2 = linear(ks[2], ks[3], layer_size, layer_size)
    wmu, bmu = linear(ks[4], ks[5], layer_size, out_features)
    wls, bls = linear(ks[6], ks[7], layer_size, out_features)
    return dict(w1=w1, b1=b1, w2=w2, b2=b2,
                wmu=wmu, bmu=bmu, wls=wls, bls=bls)


def reference_forward(x, params, eps, act_high, deterministic=False):
    """Pure-JAX f32 reference of the PyTorch module's forward."""
    h1 = jnp.maximum(x @ params["w1"] + params["b1"], 0.0)
    h2 = jnp.maximum(h1 @ params["w2"] + params["b2"], 0.0)
    mu = h2 @ params["wmu"] + params["bmu"]
    log_sigma = h2 @ params["wls"] + params["bls"]
    sigma = jnp.exp(log_sigma)
    a = mu if deterministic else mu + jnp.sqrt(sigma) * eps
    d = mu.shape[-1]
    logp = -0.5 * (jnp.sum((a - mu) ** 2 / sigma, -1) + jnp.sum(log_sigma, -1)
                   + d * _LOG_2PI)
    logp = logp - jnp.sum(2.0 * (_LOG2 - a - jax.nn.softplus(-2.0 * a)), -1)
    return act_high * jnp.tanh(a), logp


if __name__ == "__main__":
    B, IN_FEATURES, LAYER_SIZE, OUT_FEATURES = 8, 16, 32, 8
    ACT_HIGH = 2.0  # symmetric action-space bound: low = -2.0, high = +2.0

    key = jax.random.PRNGKey(0)
    k_param, k_x, k_eps = jax.random.split(key, 3)

    params = init_params(k_param, IN_FEATURES, LAYER_SIZE, OUT_FEATURES)
    kparams = prepare_params(params)
    x = jax.random.normal(k_x, (B, IN_FEATURES), jnp.float32)
    eps = jax.random.normal(k_eps, (B, OUT_FEATURES), jnp.float32)

    # stochastic path (rsample)
    action, log_prob = pi_net_forward(x, kparams, ACT_HIGH, eps=eps,
                                      deterministic=False)
    jax.block_until_ready((action, log_prob))

    # deterministic path (action = mu; no eps input at all)
    action_det, log_prob_det = pi_net_forward(x, kparams, ACT_HIGH,
                                              deterministic=True)
    jax.block_until_ready((action_det, log_prob_det))

    # shape / sanity checks
    assert action.shape == (B, OUT_FEATURES) and log_prob.shape == (B,)
    assert action_det.shape == (B, OUT_FEATURES) and log_prob_det.shape == (B,)
    assert bool(jnp.all(jnp.isfinite(action))) and bool(jnp.all(jnp.isfinite(log_prob)))
    assert bool(jnp.all(jnp.abs(action) <= ACT_HIGH))
    assert bool(jnp.all(jnp.abs(action_det) <= ACT_HIGH))

    # functional check vs. f32 reference (loose tolerance: kernel uses bf16 MXU inputs)
    ref_a, ref_lp = reference_forward(x, params, eps, ACT_HIGH, deterministic=False)
    ref_a_d, ref_lp_d = reference_forward(x, params, eps, ACT_HIGH, deterministic=True)
    assert bool(jnp.allclose(action, ref_a, atol=0.2, rtol=0.05))
    assert bool(jnp.allclose(log_prob, ref_lp, atol=0.5, rtol=0.1))
    assert bool(jnp.allclose(action_det, ref_a_d, atol=0.2, rtol=0.05))
    assert bool(jnp.allclose(log_prob_det, ref_lp_d, atol=0.5, rtol=0.1))

    print("KERNEL_OK")
</pallas_src>

<mosaic_0001>
module attributes {stable_mosaic.version = 11 : i64} {
  func.func @pi_net_kernel(%arg0: i32, %arg1: memref<8x16xf32, #tpu.memory_space<vmem>>, %arg2: memref<16x32xbf16, #tpu.memory_space<vmem>>, %arg3: memref<1x32xf32, #tpu.memory_space<vmem>>, %arg4: memref<32x32xbf16, #tpu.memory_space<vmem>>, %arg5: memref<1x32xf32, #tpu.memory_space<vmem>>, %arg6: memref<32x16xbf16, #tpu.memory_space<vmem>>, %arg7: memref<1x16xf32, #tpu.memory_space<vmem>>, %arg8: memref<8x8xf32, #tpu.memory_space<vmem>>, %arg9: memref<8x8xf32, #tpu.memory_space<vmem>>, %arg10: memref<8x1xf32, #tpu.memory_space<vmem>>) attributes {dimension_semantics = [#tpu.dimension_semantics<parallel>], iteration_bounds = array<i64: 1>, scalar_prefetch = 0 : i64, scratch_operands = 0 : i64, tpu.core_type = #tpu.core_type<tc>, window_params = [{transform_indices = @transform_0, window_bounds = array<i64: 8, 16>}, {pipeline_mode = #tpu.pipeline_mode<synchronous>, transform_indices = @transform_1, window_bounds = array<i64: 16, 32>}, {pipeline_mode = #tpu.pipeline_mode<synchronous>, transform_indices = @transform_2, window_bounds = array<i64: 1, 32>}, {pipeline_mode = #tpu.pipeline_mode<synchronous>, transform_indices = @transform_3, window_bounds = array<i64: 32, 32>}, {pipeline_mode = #tpu.pipeline_mode<synchronous>, transform_indices = @transform_4, window_bounds = array<i64: 1, 32>}, {pipeline_mode = #tpu.pipeline_mode<synchronous>, transform_indices = @transform_5, window_bounds = array<i64: 32, 16>}, {pipeline_mode = #tpu.pipeline_mode<synchronous>, transform_indices = @transform_6, window_bounds = array<i64: 1, 16>}, {transform_indices = @transform_7, window_bounds = array<i64: 8, 8>}, {transform_indices = @transform_8, window_bounds = array<i64: 8, 8>}, {transform_indices = @transform_9, window_bounds = array<i64: 8, 1>}]} {
    %c0 = arith.constant 0 : index
    %c0_0 = arith.constant 0 : index
    %0 = vector.load %arg1[%c0, %c0_0] : memref<8x16xf32, #tpu.memory_space<vmem>>, vector<8x16xf32>
    %1 = arith.truncf %0 : vector<8x16xf32> to vector<8x16xbf16>
    %c0_1 = arith.constant 0 : index
    %c0_2 = arith.constant 0 : index
    %2 = vector.load %arg2[%c0_1, %c0_2] : memref<16x32xbf16, #tpu.memory_space<vmem>>, vector<16x32xbf16>
    %cst = arith.constant dense<0.000000e+00> : vector<8x32xf32>
    %3 = tpu.matmul %1, %2, %cst {dimension_numbers = #tpu.dot_dimension_numbers<[1], [0], [0], [1], [0, 0, 1, 1], [], []>} : vector<8x16xbf16>, vector<16x32xbf16>, vector<8x32xf32> -> vector<8x32xf32>
    %c0_3 = arith.constant 0 : index
    %c0_4 = arith.constant 0 : index
    %4 = vector.load %arg3[%c0_3, %c0_4] : memref<1x32xf32, #tpu.memory_space<vmem>>, vector<1x32xf32>
    %5 = vector.broadcast %4 : vector<1x32xf32> to vector<8x32xf32>
    %6 = arith.addf %3, %5 : vector<8x32xf32>
    %cst_5 = arith.constant 0.000000e+00 : f32
    %7 = vector.broadcast %cst_5 : f32 to vector<8x32xf32>
    %8 = arith.maximumf %6, %7 : vector<8x32xf32>
    %9 = arith.truncf %8 : vector<8x32xf32> to vector<8x32xbf16>
    %c0_6 = arith.constant 0 : index
    %c0_7 = arith.constant 0 : index
    %10 = vector.load %arg4[%c0_6, %c0_7] : memref<32x32xbf16, #tpu.memory_space<vmem>>, vector<32x32xbf16>
    %cst_8 = arith.constant dense<0.000000e+00> : vector<8x32xf32>
    %11 = tpu.matmul %9, %10, %cst_8 {dimension_numbers = #tpu.dot_dimension_numbers<[1], [0], [0], [1], [0, 0, 1, 1], [], []>} : vector<8x32xbf16>, vector<32x32xbf16>, vector<8x32xf32> -> vector<8x32xf32>
    %c0_9 = arith.constant 0 : index
    %c0_10 = arith.constant 0 : index
    %12 = vector.load %arg5[%c0_9, %c0_10] : memref<1x32xf32, #tpu.memory_space<vmem>>, vector<1x32xf32>
    %13 = vector.broadcast %12 : vector<1x32xf32> to vector<8x32xf32>
    %14 = arith.addf %11, %13 : vector<8x32xf32>
    %cst_11 = arith.constant 0.000000e+00 : f32
    %15 = vector.broadcast %cst_11 : f32 to vector<8x32xf32>
    %16 = arith.maximumf %14, %15 : vector<8x32xf32>
    %17 = arith.truncf %16 : vector<8x32xf32> to vector<8x32xbf16>
    %c0_12 = arith.constant 0 : index
    %c0_13 = arith.constant 0 : index
    %18 = vector.load %arg6[%c0_12, %c0_13] : memref<32x16xbf16, #tpu.memory_space<vmem>>, vector<32x16xbf16>
    %cst_14 = arith.constant dense<0.000000e+00> : vector<8x16xf32>
    %19 = tpu.matmul %17, %18, %cst_14 {dimension_numbers = #tpu.dot_dimension_numbers<[1], [0], [0], [1], [0, 0, 1, 1], [], []>} : vector<8x32xbf16>, vector<32x16xbf16>, vector<8x16xf32> -> vector<8x16xf32>
    %c0_15 = arith.constant 0 : index
    %c0_16 = arith.constant 0 : index
    %20 = vector.load %arg7[%c0_15, %c0_16] : memref<1x16xf32, #tpu.memory_space<vmem>>, vector<1x16xf32>
    %21 = vector.broadcast %20 : vector<1x16xf32> to vector<8x16xf32>
    %22 = arith.addf %19, %21 : vector<8x16xf32>
    %23 = vector.extract_strided_slice %22 {offsets = [0, 0], sizes = [8, 8], strides = [1, 1]} : vector<8x16xf32> to vector<8x8xf32>
    %24 = vector.extract_strided_slice %22 {offsets = [0, 8], sizes = [8, 8], strides = [1, 1]} : vector<8x16xf32> to vector<8x8xf32>
    %c0_17 = arith.constant 0 : index
    %c0_18 = arith.constant 0 : index
    %25 = vector.load %arg8[%c0_17, %c0_18] : memref<8x8xf32, #tpu.memory_space<vmem>>, vector<8x8xf32>
    %cst_19 = arith.constant 5.000000e-01 : f32
    %26 = vector.broadcast %cst_19 : f32 to vector<8x8xf32>
    %27 = arith.mulf %26, %24 : vector<8x8xf32>
    %28 = math.exp %27 : vector<8x8xf32>
    %29 = arith.mulf %28, %25 : vector<8x8xf32>
    %30 = arith.addf %23, %29 : vector<8x8xf32>
    %31 = arith.mulf %25, %25 : vector<8x8xf32>
    %32 = arith.addf %31, %24 : vector<8x8xf32>
    %cst_20 = arith.constant 5.000000e-01 : f32
    %33 = vector.broadcast %cst_20 : f32 to vector<8x8xf32>
    %34 = arith.mulf %33, %32 : vector<8x8xf32>
    %cst_21 = arith.constant 0.693147182 : f32
    %35 = vector.broadcast %cst_21 : f32 to vector<8x8xf32>
    %36 = arith.subf %35, %30 : vector<8x8xf32>
    %cst_22 = arith.constant -2.000000e+00 : f32
    %37 = vector.broadcast %cst_22 : f32 to vector<8x8xf32>
    %38 = arith.mulf %37, %30 : vector<8x8xf32>
    %cst_23 = arith.constant 0.000000e+00 : f32
    %39 = vector.broadcast %cst_23 : f32 to vector<8x8xf32>
    %40 = arith.maximumf %38, %39 : vector<8x8xf32>
    %41 = math.absf %38 : vector<8x8xf32>
    %cst_24 = arith.constant 0.000000e+00 : f32
    %42 = vector.broadcast %cst_24 : f32 to vector<8x8xf32>
    %43 = arith.subf %42, %41 : vector<8x8xf32>
    %44 = math.exp %43 : vector<8x8xf32>
    %45 = math.log1p %44 : vector<8x8xf32>
    %46 = arith.addf %40, %45 : vector<8x8xf32>
    %47 = arith.subf %36, %46 : vector<8x8xf32>
    %cst_25 = arith.constant 2.000000e+00 : f32
    %48 = vector.broadcast %cst_25 : f32 to vector<8x8xf32>
    %49 = arith.mulf %48, %47 : vector<8x8xf32>
    %50 = arith.addf %34, %49 : vector<8x8xf32>
    %cst_26 = arith.constant dense<0.000000e+00> : vector<8xf32>
    %51 = vector.multi_reduction <add>, %50, %cst_26 [1] : vector<8x8xf32> to vector<8xf32>
    %52 = vector.shape_cast %51 : vector<8xf32> to vector<8x1xf32>
    %cst_27 = arith.constant 7.35150814 : f32
    %53 = vector.broadcast %cst_27 : f32 to vector<8x1xf32>
    %54 = arith.addf %52, %53 : vector<8x1xf32>
    %cst_28 = arith.constant 0.000000e+00 : f32
    %55 = vector.broadcast %cst_28 : f32 to vector<8x1xf32>
    %56 = arith.subf %55, %54 : vector<8x1xf32>
    %c0_29 = arith.constant 0 : index
    %c0_30 = arith.constant 0 : index
    %57 = vector.load %arg10[%c0_29, %c0_30] : memref<8x1xf32, #tpu.memory_space<vmem>>, vector<8x1xf32>
    tpu.vector_store %arg10[%c0_29, %c0_30], %56 {strides = array<i32>} : memref<8x1xf32, #tpu.memory_space<vmem>>, vector<8x1xf32>,
    %58 = math.tanh %30 : vector<8x8xf32>
    %cst_31 = arith.constant 2.000000e+00 : f32
    %59 = vector.broadcast %cst_31 : f32 to vector<8x8xf32>
    %60 = arith.mulf %59, %58 : vector<8x8xf32>
    %c0_32 = arith.constant 0 : index
    %c0_33 = arith.constant 0 : index
    %61 = vector.load %arg9[%c0_32, %c0_33] : memref<8x8xf32, #tpu.memory_space<vmem>>, vector<8x8xf32>
    tpu.vector_store %arg9[%c0_32, %c0_33], %60 {strides = array<i32>} : memref<8x8xf32, #tpu.memory_space<vmem>>, vector<8x8xf32>,
    return
  }
  func.func @transform_0(%arg0: i32) -> (i32, i32) {
    %c0_i32 = arith.constant 0 : i32
    %c0_i32_0 = arith.constant 0 : i32
    return %arg0, %c0_i32 : i32, i32
  }
  func.func @transform_1(%arg0: i32) -> (i32, i32) {
    %c0_i32 = arith.constant 0 : i32
    %c0_i32_0 = arith.constant 0 : i32
    %c0_i32_1 = arith.constant 0 : i32
    return %c0_i32, %c0_i32_0 : i32, i32
  }
  func.func @transform_2(%arg0: i32) -> (i32, i32) {
    %c0_i32 = arith.constant 0 : i32
    %c0_i32_0 = arith.constant 0 : i32
    %c0_i32_1 = arith.constant 0 : i32
    return %c0_i32, %c0_i32_0 : i32, i32
  }
  func.func @transform_3(%arg0: i32) -> (i32, i32) {
    %c0_i32 = arith.constant 0 : i32
    %c0_i32_0 = arith.constant 0 : i32
    %c0_i32_1 = arith.constant 0 : i32
    return %c0_i32, %c0_i32_0 : i32, i32
  }
  func.func @transform_4(%arg0: i32) -> (i32, i32) {
    %c0_i32 = arith.constant 0 : i32
    %c0_i32_0 = arith.constant 0 : i32
    %c0_i32_1 = arith.constant 0 : i32
    return %c0_i32, %c0_i32_0 : i32, i32
  }
  func.func @transform_5(%arg0: i32) -> (i32, i32) {
    %c0_i32 = arith.constant 0 : i32
    %c0_i32_0 = arith.constant 0 : i32
    %c0_i32_1 = arith.constant 0 : i32
    return %c0_i32, %c0_i32_0 : i32, i32
  }
  func.func @transform_6(%arg0: i32) -> (i32, i32) {
    %c0_i32 = arith.constant 0 : i32
    %c0_i32_0 = arith.constant 0 : i32
    %c0_i32_1 = arith.constant 0 : i32
    return %c0_i32, %c0_i32_0 : i32, i32
  }
  func.func @transform_7(%arg0: i32) -> (i32, i32) {
    %c0_i32 = arith.constant 0 : i32
    %c0_i32_0 = arith.constant 0 : i32
    return %arg0, %c0_i32 : i32, i32
  }
  func.func @transform_8(%arg0: i32) -> (i32, i32) {
    %c0_i32 = arith.constant 0 : i32
    %c0_i32_0 = arith.constant 0 : i32
    return %arg0, %c0_i32 : i32, i32
  }
  func.func @transform_9(%arg0: i32) -> (i32, i32) {
    %c0_i32 = arith.constant 0 : i32
    %c0_i32_0 = arith.constant 0 : i32
    return %arg0, %c0_i32 : i32, i32
  }
}

</mosaic_0001>

<bundles_post_ra>
// kernel: tpu_custom_call.1
= control target key start
LH: loop header
LB: loop body
LE: loop exit
PB: predicated region body
PF: predicated region fallthrough
CT: control target
= control target key end

     0   :  { %15 = vsyncpa [#allocation3], 0  ;;  %s542_s0 = inlined_call_operand.vmem [shape: f32[8,16], index: 0, kind: input, shape index: {}]   ;;  %s543_s1 = inlined_call_operand.hbm [shape: bf16[16,32], index: 1, kind: input, shape index: {}]   ;;  %s544_s2 = inlined_call_operand.vmem [shape: f32[1,32], index: 2, kind: input, shape index: {}]   ;;  %s545_s3 = inlined_call_operand.vmem [shape: bf16[32,32], index: 3, kind: input, shape index: {}]   ;;  %s546_s4 = inlined_call_operand.vmem [shape: f32[1,32], index: 4, kind: input, shape index: {}]   ;;  %s547_s5 = inlined_call_operand.vmem [shape: bf16[32,16], index: 5, kind: input, shape index: {}]   ;;  %s548_s6 = inlined_call_operand.vmem [shape: f32[1,16], index: 6, kind: input, shape index: {}]   ;;  %s549_s7 = inlined_call_operand.vmem [shape: f32[8,8], index: 7, kind: input, shape index: {}]   ;;  %s550_s8 = inlined_call_operand.hbm [shape: f32[8,8], index: 8, kind: output, shape index: {0}]   ;;  %s551_s9 = inlined_call_operand.vmem [shape: f32[8,1], index: 9, kind: output, shape index: {1}]  }
   0x1   :  { %16 = vsyncpa [#allocation4], 0  ;;  %s426_s30 = smov [#allocation2]   ;;  %s378_s13 = scalar_lea.hbm %s543_s1, 128 }
   0x2   :  { %s24_s10 = sshll.u32 %s426_s30, 4  ;;  %p379_p0 = scmp.ne.s32.totalorder %s543_s1, %s378_s13  ;;  %s25_s10 = int_to_ptr.vmem [resolvable:$true] %s24_s10 }
   0x3   :  { %p382_p1 = scmp.lt.u32.totalorder %s378_s13, %s543_s1 }
   0x5   :  { %p384_p2 = pnand %p382_p1, %p379_p0 }
   0x7   :  { %387 = shalt.err (!%p384_p2)
}
   0x8   :  { %s388_s18 = scalar_lea.vmem %s25_s10, 128  ;;  %p393_p4 = scmp.lt.s32.totalorder %s25_s10, %s25_s10 }
   0x9   :  { %p389_p3 = scmp.ne.s32.totalorder %s25_s10, %s388_s18  ;;  %p394_p5 = scmp.lt.s32.totalorder %s388_s18, %s388_s18 }
   0xb   :  { %p395_p6 = por %p394_p5, %p393_p4 }
   0xd   :  { %p396_p7 = pnand %p395_p6, %p389_p3 }
   0xf   :  { %399 = shalt.err (!%p396_p7)
}
  0x10   :  { %s427_s19 = smov 64   ;;  %s428_s20 = smov 4  }
  0x11   :  { %30 = dma.hbm_to_vmem [thread:$0]  %s543_s1, 128, %s25_s10, [#allocation3], %s427_s19, %s427_s19, %s428_s20  }
  0x12   :  { %422 = dma.done.wait [#allocation3], 128  }
  0x13   :  { %423 = vsyncadd [#allocation3], 4294967168  ;;  %v429_v0 = vmov 0.0   ;;  %vm430_vm0 = vmmov 0   ;;  %v365_v1 = vld [vmem:[#allocation2] sm:$0xff]   ;;  %vm64_vm1 = vcmask 130048  }
  0x14   :  { %335 = vmatprep.subr.bf16.mxu0 %v429_v0  ;;  %337 = vmatprep.mubr.msk.bf16.mxu0 %vm430_vm0, %v429_v0  ;;  %v47_v2 = vld [vmem:[%s542_s0] sm:$0xff]  ;;  %v367_v5 = vld [vmem:[%s545_s3 + $0x8] sm:$0xff]   ;;  %vm133_vm2 = vcmask 261120   ;;  %vm286_vm3 = vcmask 64512  }
  0x15   :  { %341 = vmatprep.subr.bf16.mxu1 %v429_v0  ;;  %345 = vmatprep.mubr.msk.bf16.mxu1 %vm430_vm0, %v429_v0  ;;  %v48_v3 = vpack.c.bf16 %v47_v2, %v47_v2  ;;  %v366_v4 = vld [vmem:[%s545_s3] sm:$0xff]   ;;  %v369_v15 = vld [vmem:[%s547_s5 + $0x8] sm:$0xff]  }
  0x16   :  { %336 = vmatpush3.bf16.msra.mxu0 %v365_v1  ;;  %342 = vmatpush3.bf16.msra.mxu1 %v366_v4  ;;  %v368_v6 = vld [vmem:[%s547_s5] sm:$0xff]  }
  0x17   :  { %349 = vmatprep.subr.bf16.mxu0 %v429_v0  ;;  %343 = vmatprep.subr.bf16.mxu1 %v429_v0  ;;  %v316_v7 = vld [vmem:[%s544_s2] ss:$0 sm:$0xff]  ;;  %s431_s2 = smov 8  }
  0x18   :  { %v245_v16 = vld [vmem:[%s549_s7] sm:$0xff]  ;;  %s432_s7 = smov 120  }
  0x19   :  { %338 = vmatmul.mubr.msk.bf16.vlgmr.msra.gmra.mrb[0].mxu0 %vm64_vm1, %v48_v3  ;;  %250 = vrot.lane.b32.xlu0 %v245_v16, %s431_s2  ;;  %v319_v17 = vld [vmem:[%s546_s4] ss:$0 sm:$0xff]  ;;  %v259_v50 = vmul.f32 %v245_v16, %v245_v16  ;;  %s433_s4 = smov [#allocation5]  }
  0x1a   :  { %353 = vmatprep.mubr.msk.bf16.mxu0 %vm430_vm0, %v429_v0  ;;  %344 = vmatpush3.bf16.msra.mxu1 %v367_v5  ;;  %v323_v25 = vld [vmem:[%s548_s6] ss:$0 sm:$0xff]  ;;  %s303_s6 = sshll.u32 %s433_s4, 4  ;;  %s304_s6 = int_to_ptr.vmem [resolvable:$true] %s303_s6 }
  0x1b   :  { %350 = vmatpush3.bf16.msra.mxu0 %v368_v6  ;;  %s400_s16 = scalar_lea.vmem %s304_s6, 128  ;;  %p405_p9 = scmp.lt.s32.totalorder %s304_s6, %s304_s6 }
  0x1c   :  { %351 = vmatprep.subr.bf16.mxu0 %v429_v0  ;;  %p401_p8 = scmp.ne.s32.totalorder %s304_s6, %s400_s16  ;;  %p406_p10 = scmp.lt.s32.totalorder %s400_s16, %s400_s16 }
  0x1e   :  { %p407_p11 = por %p406_p10, %p405_p9 }
  0x1f   :  { %352 = vmatpush3.bf16.msra.mxu0 %v369_v15 }
  0x20   :  { %p408_p12 = pnand %p407_p11, %p401_p8 }
  0x8b   :  { %v251_v33 = vpop.permute.xlu0 %250 }
  0xec   :  { %v102_v8 = vpop.f32.mrb[0].mxu0 }
  0xed   :  { %v103_v9 = vadd.f32 %v316_v7, %v102_v8  ;;  %v339_v10 = vpop.f32.mrb[1].mxu0 }
  0xee   :  { %v105_v11 = vpop.f32.mrb[2].mxu0 }
  0xef   :  { %v108_v12 = vmax.f32 %v103_v9, 0.0  ;;  %v340_v13 = vpop.f32.mrb[3].mxu0 }
  0xf1   :  { %v109_v14 = vpack.c.bf16 %v108_v12, %v108_v12 }
  0xf3   :  { %346 = vmatmul.mubr.msk.bf16.vlgmr.msra.gmra.mrb[0].mxu1 %vm133_vm2, %v109_v14 }
 0x1c6   :  { %v171_v18 = vpop.f32.mrb[0].mxu1 }
 0x1c7   :  { %v172_v19 = vadd.f32 %v319_v17, %v171_v18  ;;  %v347_v20 = vpop.f32.mrb[1].mxu1 }
 0x1c8   :  { %v174_v21 = vpop.f32.mrb[2].mxu1 }
 0x1c9   :  { %v177_v22 = vmax.f32 %v172_v19, 0.0  ;;  %v348_v23 = vpop.f32.mrb[3].mxu1 }
 0x1cb   :  { %v178_v24 = vpack.c.bf16 %v177_v22, %v177_v22 }
 0x1cd   :  { %354 = vmatmul.mubr.msk.bf16.vlgmr.msra.gmra.mrb[4].mxu0 %vm133_vm2, %v178_v24 }
 0x2a0   :  { %v239_v26 = vpop.f32.mrb[4].mxu0 }
 0x2a1   :  { %v240_v27 = vadd.f32 %v323_v25, %v239_v26  ;;  %v355_v28 = vpop.f32.mrb[5].mxu0 }
 0x2a2   :  { %v242_v29 = vpop.f32.mrb[6].mxu0 }
 0x2a3   :  { %v246_v30 = vmul.f32 0.5, %v240_v27  ;;  %261 = vrot.lane.b32.xlu1 %v240_v27, %s432_s7  ;;  %v356_v31 = vpop.f32.mrb[7].mxu0 }
 0x2a5   :  { %v247_v32 = vmul.f32 1.442695, %v246_v30 }
 0x2a7   :  { %370 = vpow2.f32 %v247_v32 }
 0x2b1   :  { %v371_v34 = vpop.eup %370 }
 0x2b2   :  { %v253_v35 = vmul.f32 %v371_v34, %v251_v33 }
 0x2b4   :  { %255 = vrot.lane.b32.xlu0 %v253_v35, %s432_s7 }
 0x315   :  { %v262_v51 = vpop.permute.xlu1 %261 }
 0x316   :  { %v264_v56 = vadd.f32 %v262_v51, %v259_v50 }
 0x318   :  { %v265_v60 = vmul.f32 0.5, %v264_v56 }
 0x326   :  { %v256_v36 = vpop.permute.xlu0 %255 }
 0x327   :  { %v258_v37 = vadd.f32 %v256_v36, %v240_v27 }
 0x329   :  { %v267_v38 = vmul.f32 -2.0, %v258_v37  ;;  %372 = vtanh.f32 %v258_v37  ;;  %v266_v57 = vsub.f32 0.6931472, %v258_v37 }
 0x32b   :  { %v269_v39 = vand.u32 2147483647, %v267_v38  ;;  %v268_v54 = vmax.f32 %v267_v38, 0.0 }
 0x32d   :  { %v270_v40 = vsub.f32 0.0, %v269_v39 }
 0x32f   :  { %v271_v41 = vmul.f32 1.442695, %v270_v40 }
 0x331   :  { %374 = vpow2.f32 %v271_v41 }
 0x333   :  { %v373_v42 = vpop.eup %372 }
 0x334   :  { %v295_v43 = vmul.f32 2.0, %v373_v42 }
 0x336   :  { %296 = vst.msk [vmem:[#allocation5] sm:$0xff] %vm286_vm3, %v295_v43 }
 0x33b   :  { %v375_v44 = vpop.eup %374 }
 0x33c   :  { %v273_v45 = vadd.f32 1.0, %v375_v44  ;;  %v276_v46 = vmul.f32 -0.5, %v375_v44  ;;  %v279_v48 = vand.u32 2147483647, %v375_v44 }
 0x33e   :  { %376 = vlog2.f32 %v273_v45  ;;  %v277_v47 = vadd.f32 1.0, %v276_v46  ;;  %vm280_vm4 = vcmp.lt.f32.partialorder %v279_v48, 0.0004427343 }
 0x340   :  { %v278_v53 = vmul.f32 %v375_v44, %v277_v47 }
 0x348   :  { %v377_v49 = vpop.eup %376 }
 0x349   :  { %v275_v52 = vmul.f32 0.6931472, %v377_v49 }
 0x34b   :  { %v281_v55 = vsel %vm280_vm4, %v278_v53, %v275_v52 }
 0x34c   :  { %v282_v58 = vadd.f32 %v281_v55, %v268_v54 }
 0x34e   :  { %v283_v59 = vsub.f32 %v266_v57, %v282_v58 }
 0x350   :  { %v284_v61 = vmul.f32 2.0, %v283_v59 }
 0x352   :  { %v285_v62 = vadd.f32 %v284_v61, %v265_v60 }
 0x354   :  { %v287_v63 = vsel %vm286_vm3, %v285_v62, 0.0 }
 0x355   :  { %288 = vadd.xlane.f32.xlu1 %v287_v63 }
 0x356   :  { %411 = shalt.err (!%p408_p12)
}
 0x357   :  { %s412_s19 = scalar_lea.hbm %s550_s8, 128 }
 0x358   :  { %p413_p13 = scmp.ne.s32.totalorder %s550_s8, %s412_s19  ;;  %p416_p0 = scmp.lt.u32.totalorder %s412_s19, %s550_s8 }
 0x35a   :  { %p418_p1 = pnand %p416_p0, %p413_p13 }
 0x35c   :  { %421 = shalt.err (!%p418_p1)
}
 0x35d   :  { %306 = dma.vmem_to_hbm [thread:$0]  %s304_s6, 128, %s550_s8, [#allocation4]   ;;  %vm292_vm5 = vcmask 7168  }
 0x3e2   :  { %v289_v0 = vpop.xlane.xlu1 %288 }
 0x3e3   :  { %v290_v1 = vadd.f32 7.351508, %v289_v0 }
 0x3e5   :  { %v291_v2 = vsub.f32 0.0, %v290_v1 }
 0x3e7   :  { %293 = vst.msk [vmem:[%s551_s9] sm:$0xff] %vm292_vm5, %v291_v2 }
 0x3e8   :  { %424 = dma.done.wait [#allocation4], 128  }
 0x3e9   :  { %425 = vsyncadd [#allocation4], 4294967168 }
 0x3ea   :  { %314 = vsyncpa [#allocation3], 1 }
 0x3eb   :  { %315 = vsyncpa [#allocation4], 1 }

</bundles_post_ra>
